<compile_context>
chip_gen: v7x
topology: tpu7x:2x2x1
jax: 0.10.0
libtpu: 0.0.40
codegen_flags: <defaults>
</compile_context>

<pallas_src>
import jax
import jax.numpy as jnp
from jax.experimental import pallas as pl
from jax.experimental.pallas import tpu as pltpu

LATENT_DIMS = 2
HIDDEN = 512
OUT = 784       # 28 * 28


def _round_up(x, m):
    return (x + m - 1) // m * m


def _choose_tm(B, tm):
    """Batch-tile rows (multiple of 8 sublanes).

    Policy (perf review): >=2 grid steps whenever B allows it (v7x 2-TC
    sharding), ~4-8 steps at moderate batch so the output writeback DMA of
    step i-1 hides under the matmul/sigmoid of step i, and 128-aligned tiles
    for large batches (v5e MXU shape efficiency). VMEM is never the limiter.
    """
    if tm is not None:
        return min(_round_up(tm, 8), _round_up(B, 8))
    if B >= 1024:
        return 256
    if B >= 256:
        return 128
    return max(8, _round_up((B + 1) // 2, 8))   # >=2 steps once B >= 16


def _decoder_kernel(z_ref, w1_ref, b1_ref, w2_ref, b2_ref, o_ref):
    # ---- layer 1: K=2 contraction as a VPU outer product (skip the MXU) ----
    z = z_ref[...]            # (tm, LATENT)   f32
    w1 = w1_ref[...]          # (LATENT, HIDDEN) f32
    h = b1_ref[...]           # (1, HIDDEN)    f32, broadcasts over rows
    for d in range(LATENT_DIMS):                      # static unroll (2 iters)
        h = h + z[:, d:d + 1] * w1[d:d + 1, :]
    h = jnp.maximum(h, 0.0)

    # ---- layer 2: MXU matmul, bf16 inputs, f32 accumulate ----
    y = jnp.dot(h.astype(jnp.bfloat16), w2_ref[...],
                preferred_element_type=jnp.float32)
    y = y + b2_ref[...]

    # sigmoid via tanh: a single EUP push per element, no exp overflow.
    o_ref[...] = (0.5 * (1.0 + jnp.tanh(0.5 * y))).astype(o_ref.dtype)


def prepare_decoder_params(w1, b1, w2, b2):
    """One-time parameter prep (do this at init, not per forward call).

    W2 is cast to bf16 here to halve the dominant HBM read in the kernel.
    """
    return (jnp.asarray(w1, jnp.float32).reshape(LATENT_DIMS, HIDDEN),
            jnp.asarray(b1, jnp.float32).reshape(1, HIDDEN),
            jnp.asarray(w2, jnp.bfloat16).reshape(HIDDEN, OUT),
            jnp.asarray(b2, jnp.float32).reshape(1, OUT))


def decoder_forward(z, params, *, tm=None):
    """z: (B, latent) f32, params from prepare_decoder_params.

    Returns (B, 1, 28, 28) f32, matching Decoder.forward.
    """
    w1, b1, w2_bf16, b2 = params
    B = z.shape[0]
    tm = _choose_tm(B, tm)
    b_pad = _round_up(B, tm)
    if b_pad != B:
        z = jnp.pad(z, ((0, b_pad - B), (0, 0)))

    grid = (b_pad // tm,)
    out = pl.pallas_call(
        _decoder_kernel,
        out_shape=jax.ShapeDtypeStruct((b_pad, OUT), jnp.float32),
        grid=grid,
        in_specs=[
            pl.BlockSpec((tm, LATENT_DIMS), lambda i: (i, 0)),      # z: batch-tiled
            pl.BlockSpec((LATENT_DIMS, HIDDEN), lambda i: (0, 0)),  # W1 resident
            pl.BlockSpec((1, HIDDEN), lambda i: (0, 0)),            # b1 resident
            pl.BlockSpec((HIDDEN, OUT), lambda i: (0, 0)),          # W2 (bf16) resident
            pl.BlockSpec((1, OUT), lambda i: (0, 0)),               # b2 resident
        ],
        out_specs=pl.BlockSpec((tm, OUT), lambda i: (i, 0)),
        compiler_params=pltpu.CompilerParams(
            dimension_semantics=("parallel",)),
    )(z, w1, b1, w2_bf16, b2)

    if b_pad != B:
        out = out[:B]
    # Free view-reshape, like torch's .reshape((-1, 1, 28, 28)).
    return out.reshape(-1, 1, 28, 28)


def decoder_reference(z, w1, b1, w2, b2):
    """Pure-JAX f32 reference of the PyTorch forward."""
    h = jnp.maximum(z @ w1 + b1, 0.0)
    y = h @ w2 + b2
    return jax.nn.sigmoid(y).reshape(-1, 1, 28, 28)


def init_params(key):
    """Deterministic synthetic parameters (PyTorch-Linear-like uniform init)."""
    k1, k2, k3, k4 = jax.random.split(key, 4)
    bound1 = 1.0 / jnp.sqrt(LATENT_DIMS)
    bound2 = 1.0 / jnp.sqrt(HIDDEN)
    w1 = jax.random.uniform(k1, (LATENT_DIMS, HIDDEN), jnp.float32, -bound1, bound1)
    b1 = jax.random.uniform(k2, (1, HIDDEN), jnp.float32, -bound1, bound1)
    w2 = jax.random.uniform(k3, (HIDDEN, OUT), jnp.float32, -bound2, bound2)
    b2 = jax.random.uniform(k4, (1, OUT), jnp.float32, -bound2, bound2)
    return w1, b1, w2, b2


if __name__ == "__main__":
    key = jax.random.PRNGKey(0)
    kz, kz2, kp = jax.random.split(key, 3)
    w1, b1, w2, b2 = init_params(kp)
    params = prepare_decoder_params(w1, b1, w2, b2)   # one-time bf16 cast of W2

    # Small case matching the original module usage.
    B = 8
    z = jax.random.normal(kz, (B, LATENT_DIMS), dtype=jnp.float32)
    out = decoder_forward(z, params)
    jax.block_until_ready(out)
    ref = decoder_reference(z, w1, b1, w2, b2)
    assert out.shape == (B, 1, 28, 28), out.shape
    err = float(jnp.max(jnp.abs(out - ref)))
    assert err < 1e-2, f"mismatch vs reference (max abs err {err})"

    # Larger batch exercising the pipelined, batch-parallel grid (grid=(4,)).
    B2 = 512
    z2 = jax.random.normal(kz2, (B2, LATENT_DIMS), dtype=jnp.float32)
    out2 = decoder_forward(z2, params)
    jax.block_until_ready(out2)
    ref2 = decoder_reference(z2, w1, b1, w2, b2)
    assert out2.shape == (B2, 1, 28, 28), out2.shape
    err2 = float(jnp.max(jnp.abs(out2 - ref2)))
    assert err2 < 1e-2, f"mismatch vs reference (max abs err {err2})"

    print("KERNEL_OK")
</pallas_src>

<mosaic_0001>
module attributes {stable_mosaic.version = 11 : i64} {
  func.func @_decoder_kernel(%arg0: i32, %arg1: memref<8x2xf32, #tpu.memory_space<vmem>>, %arg2: memref<2x512xf32, #tpu.memory_space<vmem>>, %arg3: memref<1x512xf32, #tpu.memory_space<vmem>>, %arg4: memref<512x784xbf16, #tpu.memory_space<vmem>>, %arg5: memref<1x784xf32, #tpu.memory_space<vmem>>, %arg6: memref<8x784xf32, #tpu.memory_space<vmem>>) attributes {dimension_semantics = [#tpu.dimension_semantics<parallel>], iteration_bounds = array<i64: 1>, scalar_prefetch = 0 : i64, scratch_operands = 0 : i64, tpu.core_type = #tpu.core_type<tc>, window_params = [{transform_indices = @transform_0, window_bounds = array<i64: 8, 2>}, {pipeline_mode = #tpu.pipeline_mode<synchronous>, transform_indices = @transform_1, window_bounds = array<i64: 2, 512>}, {pipeline_mode = #tpu.pipeline_mode<synchronous>, transform_indices = @transform_2, window_bounds = array<i64: 1, 512>}, {pipeline_mode = #tpu.pipeline_mode<synchronous>, transform_indices = @transform_3, window_bounds = array<i64: 512, 784>}, {pipeline_mode = #tpu.pipeline_mode<synchronous>, transform_indices = @transform_4, window_bounds = array<i64: 1, 784>}, {transform_indices = @transform_5, window_bounds = array<i64: 8, 784>}]} {
    %c0 = arith.constant 0 : index
    %c0_0 = arith.constant 0 : index
    %0 = vector.load %arg1[%c0, %c0_0] : memref<8x2xf32, #tpu.memory_space<vmem>>, vector<8x2xf32>
    %c0_1 = arith.constant 0 : index
    %c0_2 = arith.constant 0 : index
    %1 = vector.load %arg2[%c0_1, %c0_2] : memref<2x512xf32, #tpu.memory_space<vmem>>, vector<2x512xf32>
    %c0_3 = arith.constant 0 : index
    %c0_4 = arith.constant 0 : index
    %2 = vector.load %arg3[%c0_3, %c0_4] : memref<1x512xf32, #tpu.memory_space<vmem>>, vector<1x512xf32>
    %3 = vector.extract_strided_slice %0 {offsets = [0, 0], sizes = [8, 1], strides = [1, 1]} : vector<8x2xf32> to vector<8x1xf32>
    %4 = vector.extract_strided_slice %1 {offsets = [0, 0], sizes = [1, 512], strides = [1, 1]} : vector<2x512xf32> to vector<1x512xf32>
    %5 = vector.broadcast %3 : vector<8x1xf32> to vector<8x512xf32>
    %6 = vector.broadcast %4 : vector<1x512xf32> to vector<8x512xf32>
    %7 = arith.mulf %5, %6 : vector<8x512xf32>
    %8 = vector.broadcast %2 : vector<1x512xf32> to vector<8x512xf32>
    %9 = arith.addf %8, %7 : vector<8x512xf32>
    %10 = vector.extract_strided_slice %0 {offsets = [0, 1], sizes = [8, 1], strides = [1, 1]} : vector<8x2xf32> to vector<8x1xf32>
    %11 = vector.extract_strided_slice %1 {offsets = [1, 0], sizes = [1, 512], strides = [1, 1]} : vector<2x512xf32> to vector<1x512xf32>
    %12 = vector.broadcast %10 : vector<8x1xf32> to vector<8x512xf32>
    %13 = vector.broadcast %11 : vector<1x512xf32> to vector<8x512xf32>
    %14 = arith.mulf %12, %13 : vector<8x512xf32>
    %15 = arith.addf %9, %14 : vector<8x512xf32>
    %cst = arith.constant 0.000000e+00 : f32
    %16 = vector.broadcast %cst : f32 to vector<8x512xf32>
    %17 = arith.maximumf %15, %16 : vector<8x512xf32>
    %18 = arith.truncf %17 : vector<8x512xf32> to vector<8x512xbf16>
    %c0_5 = arith.constant 0 : index
    %c0_6 = arith.constant 0 : index
    %19 = vector.load %arg4[%c0_5, %c0_6] : memref<512x784xbf16, #tpu.memory_space<vmem>>, vector<512x784xbf16>
    %cst_7 = arith.constant dense<0.000000e+00> : vector<8x784xf32>
    %20 = tpu.matmul %18, %19, %cst_7 {dimension_numbers = #tpu.dot_dimension_numbers<[1], [0], [0], [1], [0, 0, 1, 1], [], []>} : vector<8x512xbf16>, vector<512x784xbf16>, vector<8x784xf32> -> vector<8x784xf32>
    %c0_8 = arith.constant 0 : index
    %c0_9 = arith.constant 0 : index
    %21 = vector.load %arg5[%c0_8, %c0_9] : memref<1x784xf32, #tpu.memory_space<vmem>>, vector<1x784xf32>
    %22 = vector.broadcast %21 : vector<1x784xf32> to vector<8x784xf32>
    %23 = arith.addf %20, %22 : vector<8x784xf32>
    %cst_10 = arith.constant 5.000000e-01 : f32
    %24 = vector.broadcast %cst_10 : f32 to vector<8x784xf32>
    %25 = arith.mulf %24, %23 : vector<8x784xf32>
    %26 = math.tanh %25 : vector<8x784xf32>
    %cst_11 = arith.constant 1.000000e+00 : f32
    %27 = vector.broadcast %cst_11 : f32 to vector<8x784xf32>
    %28 = arith.addf %27, %26 : vector<8x784xf32>
    %cst_12 = arith.constant 5.000000e-01 : f32
    %29 = vector.broadcast %cst_12 : f32 to vector<8x784xf32>
    %30 = arith.mulf %29, %28 : vector<8x784xf32>
    %c0_13 = arith.constant 0 : index
    %c0_14 = arith.constant 0 : index
    %31 = vector.load %arg6[%c0_13, %c0_14] : memref<8x784xf32, #tpu.memory_space<vmem>>, vector<8x784xf32>
    tpu.vector_store %arg6[%c0_13, %c0_14], %30 {strides = array<i32>} : memref<8x784xf32, #tpu.memory_space<vmem>>, vector<8x784xf32>,
    return
  }
  func.func @transform_0(%arg0: i32) -> (i32, i32) {
    %c0_i32 = arith.constant 0 : i32
    %c0_i32_0 = arith.constant 0 : i32
    return %arg0, %c0_i32 : i32, i32
  }
  func.func @transform_1(%arg0: i32) -> (i32, i32) {
    %c0_i32 = arith.constant 0 : i32
    %c0_i32_0 = arith.constant 0 : i32
    %c0_i32_1 = arith.constant 0 : i32
    return %c0_i32, %c0_i32_0 : i32, i32
  }
  func.func @transform_2(%arg0: i32) -> (i32, i32) {
    %c0_i32 = arith.constant 0 : i32
    %c0_i32_0 = arith.constant 0 : i32
    %c0_i32_1 = arith.constant 0 : i32
    return %c0_i32, %c0_i32_0 : i32, i32
  }
  func.func @transform_3(%arg0: i32) -> (i32, i32) {
    %c0_i32 = arith.constant 0 : i32
    %c0_i32_0 = arith.constant 0 : i32
    %c0_i32_1 = arith.constant 0 : i32
    return %c0_i32, %c0_i32_0 : i32, i32
  }
  func.func @transform_4(%arg0: i32) -> (i32, i32) {
    %c0_i32 = arith.constant 0 : i32
    %c0_i32_0 = arith.constant 0 : i32
    %c0_i32_1 = arith.constant 0 : i32
    return %c0_i32, %c0_i32_0 : i32, i32
  }
  func.func @transform_5(%arg0: i32) -> (i32, i32) {
    %c0_i32 = arith.constant 0 : i32
    %c0_i32_0 = arith.constant 0 : i32
    return %arg0, %c0_i32 : i32, i32
  }
}

</mosaic_0001>

<bundles_post_ra>
// kernel: tpu_custom_call.1
= control target key start
LH: loop header
LB: loop body
LE: loop exit
PB: predicated region body
PF: predicated region fallthrough
CT: control target
= control target key end

     0   :  { %v2622_v1 = vmov 0   ;;  %v2623_v10 = vmov 1   ;;  %s3428_s0 = inlined_call_operand.vmem [shape: f32[8,2], index: 0, kind: input, shape index: {}]   ;;  %s3429_s1 = inlined_call_operand.vmem [shape: f32[2,512], index: 1, kind: input, shape index: {}]   ;;  %s3430_s2 = inlined_call_operand.vmem [shape: f32[1,512], index: 2, kind: input, shape index: {}]   ;;  %s3431_s3 = inlined_call_operand.vmem [shape: bf16[512,784], index: 3, kind: input, shape index: {}]   ;;  %s3432_s4 = inlined_call_operand.vmem [shape: f32[1,784], index: 4, kind: input, shape index: {}]   ;;  %s3433_s5 = inlined_call_operand.hbm [shape: f32[8,784], index: 5, kind: output, shape index: {}]  }
   0x1   :  { %v22_v0 = vld [vmem:[%s3428_s0] sm:$0xff]  ;;  %2262 = vset.pattern.permute.xlu0 %v2622_v1  ;;  %v2266_v3 = vld [vmem:[%s3431_s3 + $0xc] ss:$28 sps:$4 sm:$0xff]   ;;  %v2270_v6 = vld [vmem:[%s3431_s3 + $0x3c] ss:$28 sps:$4 sm:$0xff]  }
   0x2   :  { %v2264_v2 = vld [vmem:[%s3431_s3 + $0x4] ss:$28 sps:$4 sm:$0xff]   ;;  %27 = vperm.xlu0 %2262, %v22_v0   ;;  %1679 = vmatprep.subr.bf16.mxu1 %v2266_v3  ;;  %v2274_v8 = vld [vmem:[%s3431_s3 + $0x38] ss:$28 sps:$4 sm:$0xff]   ;;  %v2280_v13 = vld [vmem:[%s3431_s3 + $0x70] ss:$28 sps:$4 sm:$0xff]  }
   0x3   :  { %v2268_v4 = vld [vmem:[%s3431_s3] ss:$28 sps:$4 sm:$0xff]   ;;  %v2269_v5 = vld [vmem:[%s3431_s3 + $0x8] ss:$28 sps:$4 sm:$0xff]   ;;  %1597 = vmatprep.subr.bf16.mxu0 %v2264_v2  ;;  %v2276_v11 = vld [vmem:[%s3431_s3 + $0x74] ss:$28 sps:$4 sm:$0xff]  }
   0x4   :  { %1598 = vmatpush1.bf16.msra.mxu0 %v2268_v4  ;;  %v2272_v7 = vld [vmem:[%s3431_s3 + $0x44] ss:$28 sps:$4 sm:$0xff]   ;;  %1680 = vmatpush1.bf16.msra.mxu1 %v2269_v5  ;;  %v2278_v12 = vld [vmem:[%s3431_s3 + $0x7c] ss:$28 sps:$4 sm:$0xff]   ;;  %v2282_v15 = vld [vmem:[%s3431_s3 + $0xac] ss:$28 sps:$4 sm:$0xff]   ;;  %v31_v5 = vlaneseq }
   0x5   :  { %1599 = vmatprep.subr.bf16.mxu0 %v2270_v6  ;;  %v2275_v9 = vld [vmem:[%s3431_s3 + $0x40] ss:$28 sps:$4 sm:$0xff]   ;;  %1681 = vmatprep.subr.bf16.mxu1 %v2272_v7  ;;  %v2281_v14 = vld [vmem:[%s3431_s3 + $0x78] ss:$28 sps:$4 sm:$0xff]   ;;  %v2286_v17 = vld [vmem:[%s3431_s3 + $0xa8] ss:$28 sps:$4 sm:$0xff]  }
   0x6   :  { %2263 = vset.pattern.permute.xlu0 %v2623_v10  ;;  %v2284_v16 = vld [vmem:[%s3431_s3 + $0xb4] ss:$28 sps:$4 sm:$0xff]   ;;  %v2288_v19 = vld [vmem:[%s3431_s3 + $0xe4] ss:$28 sps:$4 sm:$0xff]   ;;  %v2290_v20 = vld [vmem:[%s3431_s3 + $0xec] ss:$28 sps:$4 sm:$0xff]  }
   0x7   :  { %97 = vperm.xlu0 %2263, %v22_v0   ;;  %v2287_v18 = vld [vmem:[%s3431_s3 + $0xb0] ss:$28 sps:$4 sm:$0xff]   ;;  %v2292_v21 = vld [vmem:[%s3431_s3 + $0xe0] ss:$28 sps:$4 sm:$0xff]   ;;  %v2293_v22 = vld [vmem:[%s3431_s3 + $0xe8] ss:$28 sps:$4 sm:$0xff]  }
   0x8   :  { %1600 = vmatpush1.bf16.msra.mxu0 %v2274_v8  ;;  %1682 = vmatpush1.bf16.msra.mxu1 %v2275_v9  ;;  %v2294_v23 = vld [vmem:[%s3431_s3 + $0x11c] ss:$28 sps:$4 sm:$0xff]   ;;  %v2296_v24 = vld [vmem:[%s3431_s3 + $0x124] ss:$28 sps:$4 sm:$0xff]   ;;  %v2300_v27 = vld [vmem:[%s3431_s3 + $0x154] ss:$28 sps:$4 sm:$0xff]  }
   0x9   :  { %1601 = vmatprep.subr.bf16.mxu0 %v2276_v11  ;;  %1683 = vmatprep.subr.bf16.mxu1 %v2278_v12  ;;  %v2298_v25 = vld [vmem:[%s3431_s3 + $0x118] ss:$28 sps:$4 sm:$0xff]   ;;  %v2299_v26 = vld [vmem:[%s3431_s3 + $0x120] ss:$28 sps:$4 sm:$0xff]   ;;  %v2304_v29 = vld [vmem:[%s3431_s3 + $0x150] ss:$28 sps:$4 sm:$0xff]  }
   0xa   :  { %v2302_v28 = vld [vmem:[%s3431_s3 + $0x15c] ss:$28 sps:$4 sm:$0xff]   ;;  %v2306_v31 = vld [vmem:[%s3431_s3 + $0x18c] ss:$28 sps:$4 sm:$0xff]   ;;  %v2308_v32 = vld [vmem:[%s3431_s3 + $0x194] ss:$28 sps:$4 sm:$0xff]  }
   0xb   :  { %v2305_v30 = vld [vmem:[%s3431_s3 + $0x158] ss:$28 sps:$4 sm:$0xff]   ;;  %v2310_v33 = vld [vmem:[%s3431_s3 + $0x188] ss:$28 sps:$4 sm:$0xff]   ;;  %v2311_v34 = vld [vmem:[%s3431_s3 + $0x190] ss:$28 sps:$4 sm:$0xff]  }
   0xc   :  { %1602 = vmatpush1.bf16.msra.mxu0 %v2280_v13  ;;  %1684 = vmatpush1.bf16.msra.mxu1 %v2281_v14  ;;  %v2312_v35 = vld [vmem:[%s3431_s3 + $0x1c4] ss:$28 sps:$4 sm:$0xff]   ;;  %v2314_v36 = vld [vmem:[%s3431_s3 + $0x1cc] ss:$28 sps:$4 sm:$0xff]   ;;  %v2318_v39 = vld [vmem:[%s3431_s3 + $0x1fc] ss:$28 sps:$4 sm:$0xff]  }
   0xd   :  { %1603 = vmatprep.subr.bf16.mxu0 %v2282_v15  ;;  %1685 = vmatprep.subr.bf16.mxu1 %v2284_v16  ;;  %v2316_v37 = vld [vmem:[%s3431_s3 + $0x1c0] ss:$28 sps:$4 sm:$0xff]   ;;  %v2317_v38 = vld [vmem:[%s3431_s3 + $0x1c8] ss:$28 sps:$4 sm:$0xff]   ;;  %v2322_v41 = vld [vmem:[%s3431_s3 + $0x1f8] ss:$28 sps:$4 sm:$0xff]  }
   0xe   :  { %v2320_v40 = vld [vmem:[%s3431_s3 + $0x204] ss:$28 sps:$4 sm:$0xff]   ;;  %v2324_v43 = vld [vmem:[%s3431_s3 + $0x234] ss:$28 sps:$4 sm:$0xff]   ;;  %v2326_v44 = vld [vmem:[%s3431_s3 + $0x23c] ss:$28 sps:$4 sm:$0xff]  }
   0xf   :  { %v2323_v42 = vld [vmem:[%s3431_s3 + $0x200] ss:$28 sps:$4 sm:$0xff]   ;;  %v2328_v45 = vld [vmem:[%s3431_s3 + $0x230] ss:$28 sps:$4 sm:$0xff]   ;;  %v2329_v46 = vld [vmem:[%s3431_s3 + $0x238] ss:$28 sps:$4 sm:$0xff]  }
  0x10   :  { %1604 = vmatpush1.bf16.msra.mxu0 %v2286_v17  ;;  %1686 = vmatpush1.bf16.msra.mxu1 %v2287_v18  ;;  %v2330_v47 = vld [vmem:[%s3431_s3 + $0x26c] ss:$28 sps:$4 sm:$0xff]   ;;  %v2332_v48 = vld [vmem:[%s3431_s3 + $0x274] ss:$28 sps:$4 sm:$0xff]   ;;  %v2336_v51 = vld [vmem:[%s3431_s3 + $0x2a4] ss:$28 sps:$4 sm:$0xff]  }
  0x11   :  { %1605 = vmatprep.subr.bf16.mxu0 %v2288_v19  ;;  %1687 = vmatprep.subr.bf16.mxu1 %v2290_v20  ;;  %v2334_v49 = vld [vmem:[%s3431_s3 + $0x268] ss:$28 sps:$4 sm:$0xff]   ;;  %v2335_v50 = vld [vmem:[%s3431_s3 + $0x270] ss:$28 sps:$4 sm:$0xff]   ;;  %v2340_v53 = vld [vmem:[%s3431_s3 + $0x2a0] ss:$28 sps:$4 sm:$0xff]  }
  0x12   :  { %v2338_v52 = vld [vmem:[%s3431_s3 + $0x2ac] ss:$28 sps:$4 sm:$0xff]   ;;  %v2342_v55 = vld [vmem:[%s3431_s3 + $0x2dc] ss:$28 sps:$4 sm:$0xff]   ;;  %v2344_v56 = vld [vmem:[%s3431_s3 + $0x2e4] ss:$28 sps:$4 sm:$0xff]  }
  0x13   :  { %v2341_v54 = vld [vmem:[%s3431_s3 + $0x2a8] ss:$28 sps:$4 sm:$0xff]   ;;  %v2346_v57 = vld [vmem:[%s3431_s3 + $0x2d8] ss:$28 sps:$4 sm:$0xff]   ;;  %v2347_v58 = vld [vmem:[%s3431_s3 + $0x2e0] ss:$28 sps:$4 sm:$0xff]  }
  0x14   :  { %1606 = vmatpush1.bf16.msra.mxu0 %v2292_v21  ;;  %1688 = vmatpush1.bf16.msra.mxu1 %v2293_v22  ;;  %v2348_v59 = vld [vmem:[%s3431_s3 + $0x314] ss:$28 sps:$4 sm:$0xff]   ;;  %v2350_v60 = vld [vmem:[%s3431_s3 + $0x31c] ss:$28 sps:$4 sm:$0xff]   ;;  %v2354_v63 = vld [vmem:[%s3431_s3 + $0x34c] ss:$28 sps:$4 sm:$0xff]  }
  0x15   :  { %1607 = vmatprep.subr.bf16.mxu0 %v2294_v23  ;;  %1689 = vmatprep.subr.bf16.mxu1 %v2296_v24  ;;  %v2352_v61 = vld [vmem:[%s3431_s3 + $0x310] ss:$28 sps:$4 sm:$0xff]   ;;  %v2353_v62 = vld [vmem:[%s3431_s3 + $0x318] ss:$28 sps:$4 sm:$0xff]   ;;  %v2358_v1 = vld [vmem:[%s3431_s3 + $0x348] ss:$28 sps:$4 sm:$0xff]  }
  0x16   :  { %v2356_v0 = vld [vmem:[%s3431_s3 + $0x354] ss:$28 sps:$4 sm:$0xff]   ;;  %v2362_v3 = vld [vmem:[%s3431_s3 + $0x384] ss:$28 sps:$4 sm:$0xff]   ;;  %v2365_v4 = vld [vmem:[%s3431_s3 + $0x38c] ss:$28 sps:$4 sm:$0xff]  }
  0x17   :  { %v2359_v2 = vld [vmem:[%s3431_s3 + $0x350] ss:$28 sps:$4 sm:$0xff]   ;;  %v2856_v6 = vshrl.u32 %v31_v5, 7  ;;  %v23_v11 = vld [vmem:[%s3429_s1] sm:$0xff] }
  0x18   :  { %1608 = vmatpush1.bf16.msra.mxu0 %v2298_v25  ;;  %1690 = vmatpush1.bf16.msra.mxu1 %v2299_v26  ;;  %v24_v20 = vld [vmem:[%s3430_s2] sm:$0xf]  ;;  %v2372_v5 = vld [vmem:[%s3431_s3 + $0x3f0] ss:$28 sps:$4 sm:$0xff]  }
  0x19   :  { %1609 = vmatprep.subr.bf16.mxu0 %v2300_v27  ;;  %1691 = vmatprep.subr.bf16.mxu1 %v2302_v28  ;;  %v2859_v7 = vsub.s32 0, %v2856_v6  ;;  %v2862_v8 = vsub.s32 2, %v2856_v6  ;;  %v41_v9 = vsub.s32 4, %v2856_v6  ;;  %v45_v10 = vsub.s32 6, %v2856_v6 }
  0x1a   :  { %v2876_v16 = vsub.s32 1, %v2856_v6  ;;  %v2879_v17 = vsub.s32 3, %v2856_v6  ;;  %v110_v18 = vsub.s32 5, %v2856_v6  ;;  %v114_v19 = vsub.s32 7, %v2856_v6 }
  0x1b   :  { %v34_v12 = vrot.slane %v23_v11, %v2859_v7  ;;  %v38_v13 = vrot.slane %v23_v11, %v2862_v8  ;;  %v42_v14 = vrot.slane %v23_v11, %v41_v9  ;;  %v46_v15 = vrot.slane %v23_v11, %v45_v10 }
  0x1c   :  { %1610 = vmatpush1.bf16.msra.mxu0 %v2304_v29  ;;  %1692 = vmatpush1.bf16.msra.mxu1 %v2305_v30  ;;  %v103_v25 = vrot.slane %v23_v11, %v2876_v16  ;;  %v107_v26 = vrot.slane %v23_v11, %v2879_v17  ;;  %v111_v27 = vrot.slane %v23_v11, %v110_v18 }
  0x1d   :  { %1611 = vmatprep.subr.bf16.mxu0 %v2306_v31  ;;  %1693 = vmatprep.subr.bf16.mxu1 %v2308_v32  ;;  %v54_v21 = vrot.slane %v34_v12, %v2859_v7  ;;  %v58_v22 = vrot.slane %v38_v13, %v2859_v7  ;;  %v62_v23 = vrot.slane %v42_v14, %v2859_v7  ;;  %v2380_v12 = vld [vmem:[%s3431_s3 + $0x42c] ss:$28 sps:$4 sm:$0xff]   ;;  %v2383_v13 = vld [vmem:[%s3431_s3 + $0x434] ss:$28 sps:$4 sm:$0xff]  }
  0x1e   :  { %v66_v24 = vrot.slane %v46_v15, %v2859_v7  ;;  %v115_v28 = vrot.slane %v23_v11, %v114_v19  ;;  %v83_v29 = vrot.slane %v24_v20, %v2862_v8  ;;  %v75_v31 = vrot.slane %v24_v20, %v2859_v7  ;;  %v2375_v11 = vld [vmem:[%s3431_s3 + $0x3f8] ss:$28 sps:$4 sm:$0xff]   ;;  %v2378_v14 = vld [vmem:[%s3431_s3 + $0x428] ss:$28 sps:$4 sm:$0xff]   ;;  %v2381_v15 = vld [vmem:[%s3431_s3 + $0x430] ss:$28 sps:$4 sm:$0xff]  }
  0x1f   :  { %v79_v32 = vrot.slane %v24_v20, %v2876_v16 }
  0x20   :  { %1612 = vmatpush1.bf16.msra.mxu0 %v2310_v33  ;;  %1694 = vmatpush1.bf16.msra.mxu1 %v2311_v34  ;;  %v87_v33 = vrot.slane %v24_v20, %v2879_v17 }
  0x21   :  { %1613 = vmatprep.subr.bf16.mxu0 %v2312_v35  ;;  %1695 = vmatprep.subr.bf16.mxu1 %v2314_v36 }
  0x24   :  { %1614 = vmatpush1.bf16.msra.mxu0 %v2316_v37  ;;  %1696 = vmatpush1.bf16.msra.mxu1 %v2317_v38  ;;  %v123_v38 = vrot.slane %v103_v25, %v2876_v16 }
  0x25   :  { %1615 = vmatprep.subr.bf16.mxu0 %v2318_v39  ;;  %1697 = vmatprep.subr.bf16.mxu1 %v2320_v40  ;;  %v127_v39 = vrot.slane %v107_v26, %v2876_v16  ;;  %v131_v40 = vrot.slane %v111_v27, %v2876_v16 }
  0x28   :  { %1616 = vmatpush1.bf16.msra.mxu0 %v2322_v41  ;;  %1698 = vmatpush1.bf16.msra.mxu1 %v2323_v42  ;;  %v135_v41 = vrot.slane %v115_v28, %v2876_v16 }
  0x29   :  { %1617 = vmatprep.subr.bf16.mxu0 %v2324_v43  ;;  %1699 = vmatprep.subr.bf16.mxu1 %v2326_v44 }
  0x2c   :  { %1618 = vmatpush1.bf16.msra.mxu0 %v2328_v45  ;;  %1700 = vmatpush1.bf16.msra.mxu1 %v2329_v46 }
  0x2d   :  { %1619 = vmatprep.subr.bf16.mxu0 %v2330_v47  ;;  %1701 = vmatprep.subr.bf16.mxu1 %v2332_v48 }
  0x30   :  { %1620 = vmatpush1.bf16.msra.mxu0 %v2334_v49  ;;  %1702 = vmatpush1.bf16.msra.mxu1 %v2335_v50 }
  0x31   :  { %1621 = vmatprep.subr.bf16.mxu0 %v2336_v51  ;;  %1703 = vmatprep.subr.bf16.mxu1 %v2338_v52 }
  0x34   :  { %1622 = vmatpush1.bf16.msra.mxu0 %v2340_v53  ;;  %1704 = vmatpush1.bf16.msra.mxu1 %v2341_v54 }
  0x35   :  { %1623 = vmatprep.subr.bf16.mxu0 %v2342_v55  ;;  %1705 = vmatprep.subr.bf16.mxu1 %v2344_v56 }
  0x38   :  { %1624 = vmatpush1.bf16.msra.mxu0 %v2346_v57  ;;  %1706 = vmatpush1.bf16.msra.mxu1 %v2347_v58  ;;  %v2360_v57 = vld [vmem:[%s3431_s3 + $0x380] ss:$28 sps:$4 sm:$0xff]  }
  0x39   :  { %1625 = vmatprep.subr.bf16.mxu0 %v2348_v59  ;;  %1707 = vmatprep.subr.bf16.mxu1 %v2350_v60  ;;  %v2363_v59 = vld [vmem:[%s3431_s3 + $0x388] ss:$28 sps:$4 sm:$0xff]  }
  0x3c   :  { %1626 = vmatpush1.bf16.msra.mxu0 %v2352_v61  ;;  %1708 = vmatpush1.bf16.msra.mxu1 %v2353_v62  ;;  %v2368_v62 = vld [vmem:[%s3431_s3 + $0x3bc] ss:$28 sps:$4 sm:$0xff]  }
  0x3d   :  { %1627 = vmatprep.subr.bf16.mxu0 %v2354_v63  ;;  %1709 = vmatprep.subr.bf16.mxu1 %v2356_v0  ;;  %v2366_v63 = vld [vmem:[%s3431_s3 + $0x3b8] ss:$28 sps:$4 sm:$0xff]   ;;  %v2371_v0 = vld [vmem:[%s3431_s3 + $0x3c4] ss:$28 sps:$4 sm:$0xff]  }
  0x40   :  { %1628 = vmatpush1.bf16.msra.mxu0 %v2358_v1  ;;  %1710 = vmatpush1.bf16.msra.mxu1 %v2359_v2  ;;  %v2369_v2 = vld [vmem:[%s3431_s3 + $0x3c0] ss:$28 sps:$4 sm:$0xff]  }
  0x41   :  { %1638 = vmatprep.subr.bf16.mxu0 %v2362_v3  ;;  %1720 = vmatprep.subr.bf16.mxu1 %v2365_v4  ;;  %v2374_v3 = vld [vmem:[%s3431_s3 + $0x3f4] ss:$28 sps:$4 sm:$0xff]   ;;  %v2377_v4 = vld [vmem:[%s3431_s3 + $0x3fc] ss:$28 sps:$4 sm:$0xff]  }
  0x81   :  { %v28_v30 = vpop.permute.xlu0 %27 }
  0x82   :  { %v67_v34 = vmul.f32 %v54_v21, %v28_v30  ;;  %v68_v35 = vmul.f32 %v58_v22, %v28_v30  ;;  %v69_v36 = vmul.f32 %v62_v23, %v28_v30  ;;  %v70_v37 = vmul.f32 %v66_v24, %v28_v30 }
  0x84   :  { %v94_v42 = vadd.f32 %v83_v29, %v69_v36  ;;  %v92_v43 = vadd.f32 %v75_v31, %v67_v34  ;;  %v93_v44 = vadd.f32 %v79_v32, %v68_v35  ;;  %v95_v45 = vadd.f32 %v87_v33, %v70_v37 }
  0x86   :  { %v98_v46 = vpop.permute.xlu0 %97 }
  0x87   :  { %v136_v47 = vmul.f32 %v123_v38, %v98_v46  ;;  %v137_v48 = vmul.f32 %v127_v39, %v98_v46  ;;  %v138_v49 = vmul.f32 %v131_v40, %v98_v46  ;;  %v139_v50 = vmul.f32 %v135_v41, %v98_v46 }
  0x89   :  { %v140_v51 = vadd.f32 %v136_v47, %v92_v43  ;;  %v141_v52 = vadd.f32 %v137_v48, %v93_v44  ;;  %v2902_v53 = vadd.f32 %v138_v49, %v94_v42  ;;  %v143_v54 = vadd.f32 %v139_v50, %v95_v45 }
  0x8b   :  { %v144_v55 = vmax.f32 %v140_v51, 0.0  ;;  %v145_v56 = vmax.f32 %v141_v52, 0.0  ;;  %v147_v58 = vmax.f32 %v143_v54, 0.0 }
  0x8d   :  { %v2910_v60 = vpack.c.bf16 %v144_v55, %v144_v55  ;;  %v2912_v61 = vpack.c.bf16 %v145_v56, %v145_v56  ;;  %v2925_v1 = vpack.c.bf16 %v147_v58, %v147_v58 }
  0x8f   :  { %1629 = vmatprep.mubr.bf16.mxu0 %v2912_v61  ;;  %1711 = vmatprep.mubr.bf16.mxu1 %v2912_v61 }
  0x90   :  { %1630 = vmatmul.mubr.bf16.vlgmr.msra.gmra.mrb[0].mxu0 %v2910_v60  ;;  %1712 = vmatmul.mubr.bf16.vlgmr.msra.gmra.mrb[0].mxu1 %v2910_v60 }
  0x91   :  { %1639 = vmatpush1.bf16.msra.mxu0 %v2360_v57  ;;  %1721 = vmatpush1.bf16.msra.mxu1 %v2363_v59 }
  0x92   :  { %1670 = vmatprep.mubr.bf16.mxu0 %v2925_v1  ;;  %1752 = vmatprep.mubr.bf16.mxu1 %v2925_v1 }
  0x93   :  { %1640 = vmatprep.subr.bf16.mxu0 %v2368_v62  ;;  %1722 = vmatprep.subr.bf16.mxu1 %v2371_v0 }
  0x95   :  { %1641 = vmatpush1.bf16.msra.mxu0 %v2366_v63  ;;  %1723 = vmatpush1.bf16.msra.mxu1 %v2369_v2 }
  0x96   :  { %1642 = vmatprep.subr.bf16.mxu0 %v2374_v3  ;;  %1724 = vmatprep.subr.bf16.mxu1 %v2377_v4 }
  0x99   :  { %1643 = vmatpush1.bf16.msra.mxu0 %v2372_v5  ;;  %1725 = vmatpush1.bf16.msra.mxu1 %v2375_v11 }
  0x9a   :  { %10 = vsyncpa [#allocation3], 0  ;;  %1644 = vmatprep.subr.bf16.mxu0 %v2380_v12  ;;  %1726 = vmatprep.subr.bf16.mxu1 %v2383_v13  ;;  %v2386_v19 = vld [vmem:[%s3431_s3 + $0x464] ss:$28 sps:$4 sm:$0xff]   ;;  %v2389_v20 = vld [vmem:[%s3431_s3 + $0x46c] ss:$28 sps:$4 sm:$0xff]  }
  0x9b   :  { %v2384_v21 = vld [vmem:[%s3431_s3 + $0x460] ss:$28 sps:$4 sm:$0xff]   ;;  %v2387_v22 = vld [vmem:[%s3431_s3 + $0x468] ss:$28 sps:$4 sm:$0xff]   ;;  %v2390_v25 = vld [vmem:[%s3431_s3 + $0x498] ss:$28 sps:$4 sm:$0xff]  }
  0x9c   :  { %v2392_v23 = vld [vmem:[%s3431_s3 + $0x49c] ss:$28 sps:$4 sm:$0xff]   ;;  %v2395_v24 = vld [vmem:[%s3431_s3 + $0x4a4] ss:$28 sps:$4 sm:$0xff]   ;;  %v2398_v27 = vld [vmem:[%s3431_s3 + $0x4d4] ss:$28 sps:$4 sm:$0xff]  }
  0x9d   :  { %1645 = vmatpush1.bf16.msra.mxu0 %v2378_v14  ;;  %1727 = vmatpush1.bf16.msra.mxu1 %v2381_v15  ;;  %v2393_v26 = vld [vmem:[%s3431_s3 + $0x4a0] ss:$28 sps:$4 sm:$0xff]   ;;  %v2396_v29 = vld [vmem:[%s3431_s3 + $0x4d0] ss:$28 sps:$4 sm:$0xff]   ;;  %v2399_v30 = vld [vmem:[%s3431_s3 + $0x4d8] ss:$28 sps:$4 sm:$0xff]  }
  0x9e   :  { %1646 = vmatprep.subr.bf16.mxu0 %v2386_v19  ;;  %1728 = vmatprep.subr.bf16.mxu1 %v2389_v20  ;;  %v2401_v28 = vld [vmem:[%s3431_s3 + $0x4dc] ss:$28 sps:$4 sm:$0xff]   ;;  %v2404_v31 = vld [vmem:[%s3431_s3 + $0x50c] ss:$28 sps:$4 sm:$0xff]   ;;  %v2407_v32 = vld [vmem:[%s3431_s3 + $0x514] ss:$28 sps:$4 sm:$0xff]  }
  0x9f   :  { %v2402_v33 = vld [vmem:[%s3431_s3 + $0x508] ss:$28 sps:$4 sm:$0xff]   ;;  %v2405_v34 = vld [vmem:[%s3431_s3 + $0x510] ss:$28 sps:$4 sm:$0xff]   ;;  %v2408_v37 = vld [vmem:[%s3431_s3 + $0x540] ss:$28 sps:$4 sm:$0xff]  }
  0xa0   :  { %v2410_v35 = vld [vmem:[%s3431_s3 + $0x544] ss:$28 sps:$4 sm:$0xff]   ;;  %v2413_v36 = vld [vmem:[%s3431_s3 + $0x54c] ss:$28 sps:$4 sm:$0xff]   ;;  %v2416_v39 = vld [vmem:[%s3431_s3 + $0x57c] ss:$28 sps:$4 sm:$0xff]  }
  0xa1   :  { %1647 = vmatpush1.bf16.msra.mxu0 %v2384_v21  ;;  %1729 = vmatpush1.bf16.msra.mxu1 %v2387_v22  ;;  %v2411_v38 = vld [vmem:[%s3431_s3 + $0x548] ss:$28 sps:$4 sm:$0xff]   ;;  %v2414_v41 = vld [vmem:[%s3431_s3 + $0x578] ss:$28 sps:$4 sm:$0xff]   ;;  %v2417_v42 = vld [vmem:[%s3431_s3 + $0x580] ss:$28 sps:$4 sm:$0xff]  }
  0xa2   :  { %1648 = vmatprep.subr.bf16.mxu0 %v2392_v23  ;;  %1730 = vmatprep.subr.bf16.mxu1 %v2395_v24  ;;  %v2419_v40 = vld [vmem:[%s3431_s3 + $0x584] ss:$28 sps:$4 sm:$0xff]   ;;  %v2422_v43 = vld [vmem:[%s3431_s3 + $0x5b4] ss:$28 sps:$4 sm:$0xff]   ;;  %v2425_v44 = vld [vmem:[%s3431_s3 + $0x5bc] ss:$28 sps:$4 sm:$0xff]  }
  0xa3   :  { %v2420_v45 = vld [vmem:[%s3431_s3 + $0x5b0] ss:$28 sps:$4 sm:$0xff]   ;;  %v2423_v46 = vld [vmem:[%s3431_s3 + $0x5b8] ss:$28 sps:$4 sm:$0xff]   ;;  %v2426_v49 = vld [vmem:[%s3431_s3 + $0x5e8] ss:$28 sps:$4 sm:$0xff]  }
  0xa4   :  { %v2428_v47 = vld [vmem:[%s3431_s3 + $0x5ec] ss:$28 sps:$4 sm:$0xff]   ;;  %v2431_v48 = vld [vmem:[%s3431_s3 + $0x5f4] ss:$28 sps:$4 sm:$0xff]   ;;  %v2434_v51 = vld [vmem:[%s3431_s3 + $0x624] ss:$28 sps:$4 sm:$0xff]  }
  0xa5   :  { %1649 = vmatpush1.bf16.msra.mxu0 %v2390_v25  ;;  %1731 = vmatpush1.bf16.msra.mxu1 %v2393_v26  ;;  %v2429_v50 = vld [vmem:[%s3431_s3 + $0x5f0] ss:$28 sps:$4 sm:$0xff]   ;;  %v2432_v54 = vld [vmem:[%s3431_s3 + $0x620] ss:$28 sps:$4 sm:$0xff]   ;;  %v2435_v55 = vld [vmem:[%s3431_s3 + $0x628] ss:$28 sps:$4 sm:$0xff]  }
  0xa6   :  { %1650 = vmatprep.subr.bf16.mxu0 %v2398_v27  ;;  %1732 = vmatprep.subr.bf16.mxu1 %v2401_v28  ;;  %v2437_v52 = vld [vmem:[%s3431_s3 + $0x62c] ss:$28 sps:$4 sm:$0xff]   ;;  %v2440_v56 = vld [vmem:[%s3431_s3 + $0x65c] ss:$28 sps:$4 sm:$0xff]   ;;  %v2443_v57 = vld [vmem:[%s3431_s3 + $0x664] ss:$28 sps:$4 sm:$0xff]  }
  0xa7   :  { %v2438_v58 = vld [vmem:[%s3431_s3 + $0x658] ss:$28 sps:$4 sm:$0xff]   ;;  %v2441_v59 = vld [vmem:[%s3431_s3 + $0x660] ss:$28 sps:$4 sm:$0xff]   ;;  %v2444_v0 = vld [vmem:[%s3431_s3 + $0x690] ss:$28 sps:$4 sm:$0xff]  }
  0xa8   :  { %v2446_v62 = vld [vmem:[%s3431_s3 + $0x694] ss:$28 sps:$4 sm:$0xff]   ;;  %v2449_v63 = vld [vmem:[%s3431_s3 + $0x69c] ss:$28 sps:$4 sm:$0xff]   ;;  %v2452_v3 = vld [vmem:[%s3431_s3 + $0x6cc] ss:$28 sps:$4 sm:$0xff]  }
  0xa9   :  { %1651 = vmatpush1.bf16.msra.mxu0 %v2396_v29  ;;  %1733 = vmatpush1.bf16.msra.mxu1 %v2399_v30  ;;  %v2447_v2 = vld [vmem:[%s3431_s3 + $0x698] ss:$28 sps:$4 sm:$0xff]   ;;  %v2450_v5 = vld [vmem:[%s3431_s3 + $0x6c8] ss:$28 sps:$4 sm:$0xff]   ;;  %v2453_v11 = vld [vmem:[%s3431_s3 + $0x6d0] ss:$28 sps:$4 sm:$0xff]  }
  0xaa   :  { %1652 = vmatprep.subr.bf16.mxu0 %v2404_v31  ;;  %1734 = vmatprep.subr.bf16.mxu1 %v2407_v32  ;;  %v2455_v4 = vld [vmem:[%s3431_s3 + $0x6d4] ss:$28 sps:$4 sm:$0xff]   ;;  %v146_v12 = vmax.f32 %v2902_v53, 0.0  ;;  %v2463_v20 = vld [vmem:[%s3431_s3 + $0x4c] ss:$28 sps:$4 sm:$0xff]   ;;  %vm1957_vm0 = vcmask 130048  }
  0xab   :  { %v2458_v13 = vld [vmem:[%s3431_s3 + $0x14] ss:$28 sps:$4 sm:$0xff]   ;;  %v2461_v22 = vld [vmem:[%s3431_s3 + $0x48] ss:$28 sps:$4 sm:$0xff]   ;;  %v2466_v26 = vld [vmem:[%s3431_s3 + $0x80] ss:$28 sps:$4 sm:$0xff]  }
  0xac   :  { %v2459_v14 = vld [vmem:[%s3431_s3 + $0x1d8] ss:$28 sps:$4 sm:$0xff]   ;;  %v2456_v15 = vld [vmem:[%s3431_s3 + $0x10] ss:$28 sps:$4 sm:$0xff]   ;;  %v3112_v19 = vpack.c.bf16 %v146_v12, %v146_v12  ;;  %v2468_v24 = vld [vmem:[%s3431_s3 + $0x84] ss:$28 sps:$4 sm:$0xff]  }
  0xad   :  { %1653 = vmatpush1.bf16.msra.mxu0 %v2402_v33  ;;  %1735 = vmatpush1.bf16.msra.mxu1 %v2405_v34  ;;  %v2460_v53 = vld [vmem:[%s3431_s3 + $0x18] ss:$28 sps:$4 sm:$0xff]   ;;  %v2464_v21 = vld [vmem:[%s3431_s3 + $0x210] ss:$28 sps:$4 sm:$0xff]   ;;  %v2469_v25 = vld [vmem:[%s3431_s3 + $0x248] ss:$28 sps:$4 sm:$0xff]  }
  0xae   :  { %1654 = vmatprep.subr.bf16.mxu0 %v2410_v35  ;;  %1736 = vmatprep.subr.bf16.mxu1 %v2413_v36  ;;  %v2465_v23 = vld [vmem:[%s3431_s3 + $0x50] ss:$28 sps:$4 sm:$0xff]   ;;  %v2473_v27 = vld [vmem:[%s3431_s3 + $0xbc] ss:$28 sps:$4 sm:$0xff]  }
  0xaf   :  { %v2474_v28 = vld [vmem:[%s3431_s3 + $0x280] ss:$28 sps:$4 sm:$0xff]   ;;  %v2471_v29 = vld [vmem:[%s3431_s3 + $0xb8] ss:$28 sps:$4 sm:$0xff]   ;;  %v2476_v33 = vld [vmem:[%s3431_s3 + $0xf0] ss:$28 sps:$4 sm:$0xff]  }
  0xb0   :  { %v2475_v30 = vld [vmem:[%s3431_s3 + $0xc0] ss:$28 sps:$4 sm:$0xff]   ;;  %v2478_v31 = vld [vmem:[%s3431_s3 + $0xf4] ss:$28 sps:$4 sm:$0xff]   ;;  %v2483_v35 = vld [vmem:[%s3431_s3 + $0x12c] ss:$28 sps:$4 sm:$0xff]  }
  0xb1   :  { %1655 = vmatpush1.bf16.msra.mxu0 %v2408_v37  ;;  %1737 = vmatpush1.bf16.msra.mxu1 %v2411_v38  ;;  %v2479_v32 = vld [vmem:[%s3431_s3 + $0x2b8] ss:$28 sps:$4 sm:$0xff]   ;;  %v2484_v36 = vld [vmem:[%s3431_s3 + $0x2f0] ss:$28 sps:$4 sm:$0xff]   ;;  %v2481_v37 = vld [vmem:[%s3431_s3 + $0x128] ss:$28 sps:$4 sm:$0xff]  }
  0xb2   :  { %1656 = vmatprep.subr.bf16.mxu0 %v2416_v39  ;;  %1738 = vmatprep.subr.bf16.mxu1 %v2419_v40  ;;  %v2480_v34 = vld [vmem:[%s3431_s3 + $0xf8] ss:$28 sps:$4 sm:$0xff]   ;;  %v2485_v38 = vld [vmem:[%s3431_s3 + $0x130] ss:$28 sps:$4 sm:$0xff]   ;;  %v2488_v39 = vld [vmem:[%s3431_s3 + $0x164] ss:$28 sps:$4 sm:$0xff]  }
  0xb3   :  { %v2489_v40 = vld [vmem:[%s3431_s3 + $0x328] ss:$28 sps:$4 sm:$0xff]  }
  0xb4   :  { %v2523_v12 = vld [vmem:[%s3431_s3 + $0x2ec] ss:$28 sps:$4 sm:$0xff]  }
  0xb5   :  { %1657 = vmatpush1.bf16.msra.mxu0 %v2414_v41  ;;  %1739 = vmatpush1.bf16.msra.mxu1 %v2417_v42  ;;  %v2486_v41 = vld [vmem:[%s3431_s3 + $0x160] ss:$28 sps:$4 sm:$0xff]   ;;  %v2490_v42 = vld [vmem:[%s3431_s3 + $0x168] ss:$28 sps:$4 sm:$0xff]  }
  0xb6   :  { %1658 = vmatprep.subr.bf16.mxu0 %v2422_v43  ;;  %1740 = vmatprep.subr.bf16.mxu1 %v2425_v44  ;;  %v2493_v43 = vld [vmem:[%s3431_s3 + $0x19c] ss:$28 sps:$4 sm:$0xff]  }
  0xb7   :  { %v2494_v44 = vld [vmem:[%s3431_s3 + $0x360] ss:$28 sps:$4 sm:$0xff]  }
  0xb9   :  { %1659 = vmatpush1.bf16.msra.mxu0 %v2420_v45  ;;  %1741 = vmatpush1.bf16.msra.mxu1 %v2423_v46  ;;  %v2491_v45 = vld [vmem:[%s3431_s3 + $0x198] ss:$28 sps:$4 sm:$0xff]   ;;  %v2495_v46 = vld [vmem:[%s3431_s3 + $0x1a0] ss:$28 sps:$4 sm:$0xff]  }
  0xba   :  { %1660 = vmatprep.subr.bf16.mxu0 %v2428_v47  ;;  %1742 = vmatprep.subr.bf16.mxu1 %v2431_v48  ;;  %v2498_v47 = vld [vmem:[%s3431_s3 + $0x1d4] ss:$28 sps:$4 sm:$0xff]  }
  0xbb   :  { %v2499_v48 = vld [vmem:[%s3431_s3 + $0x558] ss:$28 sps:$4 sm:$0xff]  }
  0xbd   :  { %1661 = vmatpush1.bf16.msra.mxu0 %v2426_v49  ;;  %1743 = vmatpush1.bf16.msra.mxu1 %v2429_v50  ;;  %v2496_v49 = vld [vmem:[%s3431_s3 + $0x1d0] ss:$28 sps:$4 sm:$0xff]   ;;  %v2500_v50 = vld [vmem:[%s3431_s3 + $0x398] ss:$28 sps:$4 sm:$0xff]  }
  0xbe   :  { %1662 = vmatprep.subr.bf16.mxu0 %v2434_v51  ;;  %1744 = vmatprep.subr.bf16.mxu1 %v2437_v52  ;;  %v2503_v51 = vld [vmem:[%s3431_s3 + $0x20c] ss:$28 sps:$4 sm:$0xff]  }
  0xbf   :  { %v2504_v52 = vld [vmem:[%s3431_s3 + $0x590] ss:$28 sps:$4 sm:$0xff]  }
  0xc1   :  { %1663 = vmatpush1.bf16.msra.mxu0 %v2432_v54  ;;  %1745 = vmatpush1.bf16.msra.mxu1 %v2435_v55  ;;  %v2501_v54 = vld [vmem:[%s3431_s3 + $0x208] ss:$28 sps:$4 sm:$0xff]   ;;  %v2505_v55 = vld [vmem:[%s3431_s3 + $0x3d0] ss:$28 sps:$4 sm:$0xff]  }
  0xc2   :  { %1664 = vmatprep.subr.bf16.mxu0 %v2440_v56  ;;  %1746 = vmatprep.subr.bf16.mxu1 %v2443_v57  ;;  %v2508_v56 = vld [vmem:[%s3431_s3 + $0x244] ss:$28 sps:$4 sm:$0xff]  }
  0xc3   :  { %v2509_v57 = vld [vmem:[%s3431_s3 + $0x5c8] ss:$28 sps:$4 sm:$0xff]  }
  0xc5   :  { %1665 = vmatpush1.bf16.msra.mxu0 %v2438_v58  ;;  %1747 = vmatpush1.bf16.msra.mxu1 %v2441_v59  ;;  %v2506_v58 = vld [vmem:[%s3431_s3 + $0x240] ss:$28 sps:$4 sm:$0xff]   ;;  %v2510_v59 = vld [vmem:[%s3431_s3 + $0x408] ss:$28 sps:$4 sm:$0xff]  }
  0xc6   :  { %1666 = vmatprep.subr.bf16.mxu0 %v2446_v62  ;;  %1748 = vmatprep.subr.bf16.mxu1 %v2449_v63  ;;  %v2513_v62 = vld [vmem:[%s3431_s3 + $0x27c] ss:$28 sps:$4 sm:$0xff]  }
  0xc7   :  { %v2514_v63 = vld [vmem:[%s3431_s3 + $0x600] ss:$28 sps:$4 sm:$0xff]  }
  0xc9   :  { %1667 = vmatpush1.bf16.msra.mxu0 %v2444_v0  ;;  %1749 = vmatpush1.bf16.msra.mxu1 %v2447_v2  ;;  %v2511_v0 = vld [vmem:[%s3431_s3 + $0x278] ss:$28 sps:$4 sm:$0xff]   ;;  %v2515_v2 = vld [vmem:[%s3431_s3 + $0x440] ss:$28 sps:$4 sm:$0xff]  }
  0xca   :  { %1668 = vmatprep.subr.bf16.mxu0 %v2452_v3  ;;  %1750 = vmatprep.subr.bf16.mxu1 %v2455_v4  ;;  %v2518_v3 = vld [vmem:[%s3431_s3 + $0x2b4] ss:$28 sps:$4 sm:$0xff]  }
  0xcb   :  { %v2519_v4 = vld [vmem:[%s3431_s3 + $0x638] ss:$28 sps:$4 sm:$0xff]  }
  0xcd   :  { %1669 = vmatpush1.bf16.msra.mxu0 %v2450_v5  ;;  %1751 = vmatpush1.bf16.msra.mxu1 %v2453_v11  ;;  %v2516_v5 = vld [vmem:[%s3431_s3 + $0x2b0] ss:$28 sps:$4 sm:$0xff]   ;;  %v2520_v11 = vld [vmem:[%s3431_s3 + $0x478] ss:$28 sps:$4 sm:$0xff]  }
  0xce   :  { %1761 = vmatprep.subr.bf16.mxu0 %v2458_v13  ;;  %2197 = vmatprep.subr.bf16.mxu1 %v2459_v14  ;;  %v2524_v13 = vld [vmem:[%s3431_s3 + $0x670] ss:$28 sps:$4 sm:$0xff]   ;;  %v2521_v14 = vld [vmem:[%s3431_s3 + $0x2e8] ss:$28 sps:$4 sm:$0xff]  }
  0xd0   :  { %1671 = vmatmul.mubr.bf16.vlgmr.msra.gmra.mrb[0].mxu0 %v3112_v19  ;;  %1753 = vmatmul.mubr.bf16.vlgmr.msra.gmra.mrb[0].mxu1 %v3112_v19 }
  0xd1   :  { %1762 = vmatpush1.bf16.msra.mxu0 %v2456_v15  ;;  %1793 = vmatprep.mubr.bf16.mxu0 %v2912_v61  ;;  %v2525_v15 = vld [vmem:[%s3431_s3 + $0x4b0] ss:$28 sps:$4 sm:$0xff]  }
  0xd2   :  { %2198 = vmatpush3.bf16.msra.mxu1 %v2460_v53  ;;  %1875 = vmatprep.mubr.bf16.mxu1 %v2912_v61  ;;  %v2470_v61 = vld [vmem:[%s3431_s3 + $0x88] ss:$28 sps:$4 sm:$0xff]  }
  0xd3   :  { %1763 = vmatprep.subr.bf16.mxu0 %v2463_v20  ;;  %2199 = vmatprep.subr.bf16.mxu1 %v2464_v21  ;;  %v2528_v53 = vld [vmem:[%s3431_s3 + $0x324] ss:$28 sps:$4 sm:$0xff]  }
  0xd4   :  { %v2529_v20 = vld [vmem:[%s3431_s3 + $0x6a8] ss:$28 sps:$4 sm:$0xff]   ;;  %v2526_v21 = vld [vmem:[%s3431_s3 + $0x320] ss:$28 sps:$4 sm:$0xff]  }
  0xd5   :  { %1764 = vmatpush1.bf16.msra.mxu0 %v2461_v22  ;;  %v2530_v22 = vld [vmem:[%s3431_s3 + $0x4e8] ss:$28 sps:$4 sm:$0xff]  }
  0xd6   :  { %2200 = vmatpush3.bf16.msra.mxu1 %v2465_v23  ;;  %1765 = vmatprep.subr.bf16.mxu0 %v2468_v24  ;;  %v2533_v23 = vld [vmem:[%s3431_s3 + $0x35c] ss:$28 sps:$4 sm:$0xff]  }
  0xd7   :  { %2201 = vmatprep.subr.bf16.mxu1 %v2469_v25  ;;  %v2534_v24 = vld [vmem:[%s3431_s3 + $0x6e0] ss:$28 sps:$4 sm:$0xff]   ;;  %v2531_v25 = vld [vmem:[%s3431_s3 + $0x358] ss:$28 sps:$4 sm:$0xff]  }
  0xd9   :  { %1766 = vmatpush1.bf16.msra.mxu0 %v2466_v26  ;;  %v2535_v26 = vld [vmem:[%s3431_s3 + $0x520] ss:$28 sps:$4 sm:$0xff]  }
  0xda   :  { %2202 = vmatpush3.bf16.msra.mxu1 %v2470_v61  ;;  %1767 = vmatprep.subr.bf16.mxu0 %v2473_v27  ;;  %v2538_v61 = vld [vmem:[%s3431_s3 + $0x394] ss:$28 sps:$4 sm:$0xff]  }
  0xdb   :  { %2203 = vmatprep.subr.bf16.mxu1 %v2474_v28  ;;  %v2536_v27 = vld [vmem:[%s3431_s3 + $0x390] ss:$28 sps:$4 sm:$0xff]  }
  0xdc   :  { %v2541_v28 = vld [vmem:[%s3431_s3 + $0x3cc] ss:$28 sps:$4 sm:$0xff]  }
  0xdd   :  { %1768 = vmatpush1.bf16.msra.mxu0 %v2471_v29  ;;  %v2539_v29 = vld [vmem:[%s3431_s3 + $0x3c8] ss:$28 sps:$4 sm:$0xff]  }
  0xde   :  { %2204 = vmatpush3.bf16.msra.mxu1 %v2475_v30  ;;  %1769 = vmatprep.subr.bf16.mxu0 %v2478_v31  ;;  %v2544_v30 = vld [vmem:[%s3431_s3 + $0x404] ss:$28 sps:$4 sm:$0xff]  }
  0xdf   :  { %2205 = vmatprep.subr.bf16.mxu1 %v2479_v32  ;;  %v2542_v31 = vld [vmem:[%s3431_s3 + $0x400] ss:$28 sps:$4 sm:$0xff]   ;;  %v2550_v32 = vld [vmem:[%s3431_s3 + $0x474] ss:$28 sps:$4 sm:$0xff]  }
  0xe1   :  { %1770 = vmatpush1.bf16.msra.mxu0 %v2476_v33  ;;  %v2548_v33 = vld [vmem:[%s3431_s3 + $0x470] ss:$28 sps:$4 sm:$0xff]  }
  0xe2   :  { %2206 = vmatpush3.bf16.msra.mxu1 %v2480_v34  ;;  %1771 = vmatprep.subr.bf16.mxu0 %v2483_v35  ;;  %v2553_v34 = vld [vmem:[%s3431_s3 + $0x4ac] ss:$28 sps:$4 sm:$0xff]  }
  0xe3   :  { %2207 = vmatprep.subr.bf16.mxu1 %v2484_v36  ;;  %v2551_v35 = vld [vmem:[%s3431_s3 + $0x4a8] ss:$28 sps:$4 sm:$0xff]  }
  0xe4   :  { %v2556_v36 = vld [vmem:[%s3431_s3 + $0x4e4] ss:$28 sps:$4 sm:$0xff]  }
  0xe5   :  { %1772 = vmatpush1.bf16.msra.mxu0 %v2481_v37  ;;  %v2554_v37 = vld [vmem:[%s3431_s3 + $0x4e0] ss:$28 sps:$4 sm:$0xff]  }
  0xe6   :  { %2208 = vmatpush3.bf16.msra.mxu1 %v2485_v38  ;;  %1773 = vmatprep.subr.bf16.mxu0 %v2488_v39  ;;  %v2559_v38 = vld [vmem:[%s3431_s3 + $0x51c] ss:$28 sps:$4 sm:$0xff]  }
  0xe7   :  { %2209 = vmatprep.subr.bf16.mxu1 %v2489_v40  ;;  %v2557_v39 = vld [vmem:[%s3431_s3 + $0x518] ss:$28 sps:$4 sm:$0xff]  }
  0xe8   :  { %v2562_v40 = vld [vmem:[%s3431_s3 + $0x554] ss:$28 sps:$4 sm:$0xff]  }
  0xe9   :  { %1774 = vmatpush1.bf16.msra.mxu0 %v2486_v41  ;;  %v2560_v41 = vld [vmem:[%s3431_s3 + $0x550] ss:$28 sps:$4 sm:$0xff]  }
  0xea   :  { %2210 = vmatpush3.bf16.msra.mxu1 %v2490_v42  ;;  %1775 = vmatprep.subr.bf16.mxu0 %v2493_v43  ;;  %v2565_v42 = vld [vmem:[%s3431_s3 + $0x58c] ss:$28 sps:$4 sm:$0xff]  }
  0xeb   :  { %2211 = vmatprep.subr.bf16.mxu1 %v2494_v44  ;;  %v2563_v43 = vld [vmem:[%s3431_s3 + $0x588] ss:$28 sps:$4 sm:$0xff]  }
  0xec   :  { %v2568_v44 = vld [vmem:[%s3431_s3 + $0x5c4] ss:$28 sps:$4 sm:$0xff]  }
  0xed   :  { %1776 = vmatpush1.bf16.msra.mxu0 %v2491_v45  ;;  %v2566_v45 = vld [vmem:[%s3431_s3 + $0x5c0] ss:$28 sps:$4 sm:$0xff]  }
  0xee   :  { %2212 = vmatpush3.bf16.msra.mxu1 %v2495_v46  ;;  %1777 = vmatprep.subr.bf16.mxu0 %v2498_v47  ;;  %v2571_v46 = vld [vmem:[%s3431_s3 + $0x5fc] ss:$28 sps:$4 sm:$0xff]  }
  0xef   :  { %2219 = vmatprep.subr.bf16.mxu1 %v2499_v48  ;;  %v2569_v47 = vld [vmem:[%s3431_s3 + $0x5f8] ss:$28 sps:$4 sm:$0xff]  }
  0xf0   :  { %v2574_v48 = vld [vmem:[%s3431_s3 + $0x634] ss:$28 sps:$4 sm:$0xff]  }
  0xf1   :  { %1876 = vmatmul.mubr.bf16.vlgmr.msra.gmra.mrb[4].mxu1 %v2910_v60  ;;  %1778 = vmatpush1.bf16.msra.mxu0 %v2496_v49  ;;  %v2572_v49 = vld [vmem:[%s3431_s3 + $0x630] ss:$28 sps:$4 sm:$0xff]  }
  0xf2   :  { %2220 = vmatpush3.bf16.msra.mxu1 %v2500_v50  ;;  %1915 = vmatprep.mubr.bf16.mxu1 %v2925_v1  ;;  %v2577_v50 = vld [vmem:[%s3431_s3 + $0x66c] ss:$28 sps:$4 sm:$0xff]  }
  0xf3   :  { %1779 = vmatprep.subr.bf16.mxu0 %v2503_v51  ;;  %2221 = vmatprep.subr.bf16.mxu1 %v2504_v52  ;;  %v2575_v51 = vld [vmem:[%s3431_s3 + $0x668] ss:$28 sps:$4 sm:$0xff]  }
  0xf4   :  { %v2580_v52 = vld [vmem:[%s3431_s3 + $0x6a4] ss:$28 sps:$4 sm:$0xff]  }
  0xf5   :  { %1780 = vmatpush1.bf16.msra.mxu0 %v2501_v54  ;;  %v2578_v54 = vld [vmem:[%s3431_s3 + $0x6a0] ss:$28 sps:$4 sm:$0xff]  }
  0xf6   :  { %2222 = vmatpush3.bf16.msra.mxu1 %v2505_v55  ;;  %1781 = vmatprep.subr.bf16.mxu0 %v2508_v56  ;;  %v2583_v55 = vld [vmem:[%s3431_s3 + $0x6dc] ss:$28 sps:$4 sm:$0xff]  }
  0xf7   :  { %2223 = vmatprep.subr.bf16.mxu1 %v2509_v57  ;;  %v2581_v56 = vld [vmem:[%s3431_s3 + $0x6d8] ss:$28 sps:$4 sm:$0xff]   ;;  %v408_v57 = vld [vmem:[%s3432_s4] sm:$0x7f] }
  0xf9   :  { %1782 = vmatpush1.bf16.msra.mxu0 %v2506_v58  ;;  %v413_v58 = vrot.slane %v408_v57, %v2859_v7 }
  0xfa   :  { %2224 = vmatpush3.bf16.msra.mxu1 %v2510_v59  ;;  %1783 = vmatprep.subr.bf16.mxu0 %v2513_v62  ;;  %v421_v59 = vrot.slane %v408_v57, %v2862_v8  ;;  %v417_v62 = vrot.slane %v408_v57, %v2876_v16 }
  0xfb   :  { %2225 = vmatprep.subr.bf16.mxu1 %v2514_v63  ;;  %v425_v63 = vrot.slane %v408_v57, %v2879_v17 }
  0xfd   :  { %1784 = vmatpush1.bf16.msra.mxu0 %v2511_v0 }
  0xfe   :  { %2226 = vmatpush3.bf16.msra.mxu1 %v2515_v2  ;;  %1785 = vmatprep.subr.bf16.mxu0 %v2518_v3 }
  0xff   :  { %2227 = vmatprep.subr.bf16.mxu1 %v2519_v4 }
 0x101   :  { %1786 = vmatpush1.bf16.msra.mxu0 %v2516_v5 }
 0x102   :  { %2228 = vmatpush3.bf16.msra.mxu1 %v2520_v11  ;;  %1787 = vmatprep.subr.bf16.mxu0 %v2523_v12 }
 0x103   :  { %2229 = vmatprep.subr.bf16.mxu1 %v2524_v13 }
 0x105   :  { %1788 = vmatpush1.bf16.msra.mxu0 %v2521_v14 }
 0x106   :  { %2230 = vmatpush3.bf16.msra.mxu1 %v2525_v15  ;;  %1789 = vmatprep.subr.bf16.mxu0 %v2528_v53 }
 0x107   :  { %2231 = vmatprep.subr.bf16.mxu1 %v2529_v20 }
 0x109   :  { %1790 = vmatpush1.bf16.msra.mxu0 %v2526_v21 }
 0x10a   :  { %2232 = vmatpush3.bf16.msra.mxu1 %v2530_v22  ;;  %1791 = vmatprep.subr.bf16.mxu0 %v2533_v23 }
 0x10b   :  { %2233 = vmatprep.subr.bf16.mxu1 %v2534_v24 }
 0x10d   :  { %1792 = vmatpush1.bf16.msra.mxu0 %v2531_v25 }
 0x10e   :  { %2234 = vmatpush3.bf16.msra.mxu1 %v2535_v26  ;;  %1802 = vmatprep.subr.bf16.mxu0 %v2538_v61 }
 0x110   :  { %1794 = vmatmul.mubr.bf16.vlgmr.msra.gmra.mrb[4].mxu0 %v2910_v60  ;;  %v2547_v60 = vld [vmem:[%s3431_s3 + $0x43c] ss:$28 sps:$4 sm:$0xff]  }
 0x111   :  { %1916 = vmatmul.mubr.bf16.vlgmr.msra.gmra.mrb[8].mxu1 %v3112_v19  ;;  %1803 = vmatpush1.bf16.msra.mxu0 %v2536_v27 }
 0x112   :  { %1834 = vmatprep.mubr.bf16.mxu0 %v2925_v1  ;;  %1804 = vmatprep.subr.bf16.mxu0 %v2541_v28  ;;  %v2545_v1 = vld [vmem:[%s3431_s3 + $0x438] ss:$28 sps:$4 sm:$0xff]   ;;  %s2624_s3 = smov [#allocation2]  }
 0x113   :  { %s1965_s4 = sshll.u32 %s2624_s3, 4  ;;  %s1966_s4 = int_to_ptr.vmem [resolvable:$true] %s1965_s4 }
 0x114   :  { %s2598_s8 = scalar_lea.vmem %s1966_s4, 896  ;;  %p2603_p1 = scmp.lt.s32.totalorder %s1966_s4, %s1966_s4 }
 0x115   :  { %1805 = vmatpush1.bf16.msra.mxu0 %v2539_v29  ;;  %p2599_p0 = scmp.ne.s32.totalorder %s1966_s4, %s2598_s8  ;;  %p2604_p2 = scmp.lt.s32.totalorder %s2598_s8, %s2598_s8 }
 0x116   :  { %1806 = vmatprep.subr.bf16.mxu0 %v2544_v30 }
 0x117   :  { %p2605_p3 = por %p2604_p2, %p2603_p1 }
 0x119   :  { %1807 = vmatpush1.bf16.msra.mxu0 %v2542_v31  ;;  %p2606_p4 = pnand %p2605_p3, %p2599_p0 }
 0x11a   :  { %1808 = vmatprep.subr.bf16.mxu0 %v2547_v60 }
 0x11d   :  { %1809 = vmatpush1.bf16.msra.mxu0 %v2545_v1 }
 0x11e   :  { %1810 = vmatprep.subr.bf16.mxu0 %v2550_v32 }
 0x121   :  { %1811 = vmatpush1.bf16.msra.mxu0 %v2548_v33 }
 0x122   :  { %1812 = vmatprep.subr.bf16.mxu0 %v2553_v34  ;;  %v437_v34 = vrot.slane %v408_v57, %v45_v10  ;;  %v433_v10 = vrot.slane %v408_v57, %v110_v18 }
 0x125   :  { %1813 = vmatpush1.bf16.msra.mxu0 %v2551_v35 }
 0x126   :  { %1814 = vmatprep.subr.bf16.mxu0 %v2556_v36 }
 0x129   :  { %1815 = vmatpush1.bf16.msra.mxu0 %v2554_v37 }
 0x12a   :  { %1816 = vmatprep.subr.bf16.mxu0 %v2559_v38 }
 0x12d   :  { %1817 = vmatpush1.bf16.msra.mxu0 %v2557_v39 }
 0x12e   :  { %1818 = vmatprep.subr.bf16.mxu0 %v2562_v40 }
 0x131   :  { %1819 = vmatpush1.bf16.msra.mxu0 %v2560_v41 }
 0x132   :  { %1820 = vmatprep.subr.bf16.mxu0 %v2565_v42 }
 0x135   :  { %1821 = vmatpush1.bf16.msra.mxu0 %v2563_v43 }
 0x136   :  { %1822 = vmatprep.subr.bf16.mxu0 %v2568_v44 }
 0x139   :  { %1823 = vmatpush1.bf16.msra.mxu0 %v2566_v45 }
 0x13a   :  { %1824 = vmatprep.subr.bf16.mxu0 %v2571_v46  ;;  %v429_v46 = vrot.slane %v408_v57, %v41_v9 }
 0x13d   :  { %1825 = vmatpush1.bf16.msra.mxu0 %v2569_v47 }
 0x13e   :  { %1826 = vmatprep.subr.bf16.mxu0 %v2574_v48 }
 0x141   :  { %1827 = vmatpush1.bf16.msra.mxu0 %v2572_v49 }
 0x142   :  { %1828 = vmatprep.subr.bf16.mxu0 %v2577_v50 }
 0x145   :  { %1829 = vmatpush1.bf16.msra.mxu0 %v2575_v51 }
 0x146   :  { %1830 = vmatprep.subr.bf16.mxu0 %v2580_v52 }
 0x149   :  { %1831 = vmatpush1.bf16.msra.mxu0 %v2578_v54 }
 0x14a   :  { %1832 = vmatprep.subr.bf16.mxu0 %v2583_v55 }
 0x14d   :  { %1833 = vmatpush1.bf16.msra.mxu0 %v2581_v56 }
 0x150   :  { %1835 = vmatmul.mubr.bf16.vlgmr.msra.gmra.mrb[4].mxu0 %v3112_v19 }
 0x1a3   :  { %v1672_v0 = vpop.f32.mrb[0].mxu0  ;;  %v1754_v2 = vpop.f32.mrb[0].mxu1 }
 0x1a4   :  { %v2241_v3 = vadd.f32 %v1672_v0, %v413_v58  ;;  %v2243_v4 = vadd.f32 %v1754_v2, %v421_v59  ;;  %v1674_v5 = vpop.f32.mrb[1].mxu0  ;;  %v1756_v11 = vpop.f32.mrb[1].mxu1 }
 0x1a5   :  { %v2242_v12 = vadd.f32 %v1674_v5, %v417_v62  ;;  %v2244_v19 = vadd.f32 %v1756_v11, %v425_v63  ;;  %v1676_v13 = vpop.f32.mrb[2].mxu0  ;;  %v1758_v14 = vpop.f32.mrb[2].mxu1 }
 0x1a6   :  { %v1923_v15 = vmul.f32 0.5, %v2241_v3  ;;  %v1925_v53 = vmul.f32 0.5, %v2243_v4  ;;  %v1677_v20 = vpop.f32.mrb[3].mxu0  ;;  %v1759_v7 = vpop.f32.mrb[3].mxu1 }
 0x1a7   :  { %v1924_v21 = vmul.f32 0.5, %v2242_v12  ;;  %v1926_v8 = vmul.f32 0.5, %v2244_v19 }
 0x1a8   :  { %2584 = vtanh.f32 %v1923_v15 }
 0x1a9   :  { %2586 = vtanh.f32 %v1925_v53 }
 0x1aa   :  { %2588 = vtanh.f32 %v1924_v21 }
 0x1ab   :  { %2590 = vtanh.f32 %v1926_v8 }
 0x1b2   :  { %v2585_v16 = vpop.eup %2584 }
 0x1b3   :  { %v2587_v17 = vpop.eup %2586  ;;  %v1937_v22 = vadd.f32 1.0, %v2585_v16 }
 0x1b4   :  { %v2589_v23 = vpop.eup %2588  ;;  %v1939_v24 = vadd.f32 1.0, %v2587_v17 }
 0x1b5   :  { %v2591_v25 = vpop.eup %2590  ;;  %v1944_v26 = vmul.f32 0.5, %v1937_v22  ;;  %v1938_v61 = vadd.f32 1.0, %v2589_v23 }
 0x1b6   :  { %v1946_v27 = vmul.f32 0.5, %v1939_v24  ;;  %v1940_v28 = vadd.f32 1.0, %v2591_v25 }
 0x1b7   :  { %1951 = vst [vmem:[#allocation2] sm:$0xff] %v1944_v26  ;;  %v1945_v29 = vmul.f32 0.5, %v1938_v61 }
 0x1b8   :  { %1953 = vst [vmem:[#allocation2 + $0x10] sm:$0xff] %v1946_v27  ;;  %v1947_v30 = vmul.f32 0.5, %v1940_v28 }
 0x1b9   :  { %1952 = vst [vmem:[#allocation2 + $0x8] sm:$0xff] %v1945_v29 }
 0x1ba   :  { %1954 = vst [vmem:[#allocation2 + $0x18] sm:$0xff] %v1947_v30 }
 0x1c4   :  { %v2213_v31 = vpop.f32.mrb[4].mxu1 }
 0x1c5   :  { %v2214_v60 = vpop.f32.mrb[5].mxu1 }
 0x1c6   :  { %v2215_v1 = vadd.f32 %v2214_v60, %v2213_v31  ;;  %v2216_v32 = vpop.f32.mrb[6].mxu1 }
 0x1c7   :  { %v2217_v33 = vpop.f32.mrb[7].mxu1 }
 0x1c8   :  { %v1878_v37 = vadd.f32 %v2215_v1, %v437_v34 }
 0x1e4   :  { %v2235_v35 = vpop.f32.mrb[8].mxu1 }
 0x1e5   :  { %v2236_v36 = vpop.f32.mrb[9].mxu1 }
 0x1e6   :  { %v2237_v38 = vadd.f32 %v2236_v36, %v2235_v35  ;;  %v2238_v39 = vpop.f32.mrb[10].mxu1 }
 0x1e7   :  { %v2239_v40 = vpop.f32.mrb[11].mxu1 }
 0x1e8   :  { %v1918_v41 = vadd.f32 %v2237_v38, %v1878_v37 }
 0x1ea   :  { %v1929_v42 = vmul.f32 0.5, %v1918_v41 }
 0x1ec   :  { %2592 = vtanh.f32 %v1929_v42 }
 0x1f6   :  { %v2593_v43 = vpop.eup %2592 }
 0x1f7   :  { %v1943_v44 = vadd.f32 1.0, %v2593_v43 }
 0x1f9   :  { %v1950_v45 = vmul.f32 0.5, %v1943_v44 }
 0x1fb   :  { %1958 = vst.msk [vmem:[#allocation2 + $0x30] sm:$0xff] %vm1957_vm0, %v1950_v45 }
 0x223   :  { %v1836_v47 = vpop.f32.mrb[4].mxu0 }
 0x224   :  { %v2245_v48 = vadd.f32 %v1836_v47, %v429_v46  ;;  %v1838_v49 = vpop.f32.mrb[5].mxu0 }
 0x225   :  { %v2246_v50 = vadd.f32 %v1838_v49, %v433_v10  ;;  %v1840_v51 = vpop.f32.mrb[6].mxu0 }
 0x226   :  { %v1927_v52 = vmul.f32 0.5, %v2245_v48  ;;  %v1841_v54 = vpop.f32.mrb[7].mxu0 }
 0x227   :  { %v1928_v55 = vmul.f32 0.5, %v2246_v50 }
 0x228   :  { %2594 = vtanh.f32 %v1927_v52 }
 0x229   :  { %2596 = vtanh.f32 %v1928_v55 }
 0x232   :  { %v2595_v56 = vpop.eup %2594 }
 0x233   :  { %v2597_v58 = vpop.eup %2596  ;;  %v1941_v59 = vadd.f32 1.0, %v2595_v56 }
 0x234   :  { %v1942_v62 = vadd.f32 1.0, %v2597_v58 }
 0x235   :  { %v1948_v9 = vmul.f32 0.5, %v1941_v59 }
 0x236   :  { %v1949_v63 = vmul.f32 0.5, %v1942_v62 }
 0x237   :  { %1955 = vst [vmem:[#allocation2 + $0x20] sm:$0xff] %v1948_v9 }
 0x238   :  { %1956 = vst [vmem:[#allocation2 + $0x28] sm:$0xff] %v1949_v63 }
 0x239   :  { %2609 = shalt.err (!%p2606_p4)
}
 0x23a   :  { %s2610_s11 = scalar_lea.hbm %s3433_s5, 896 }
 0x23b   :  { %p2611_p5 = scmp.ne.s32.totalorder %s3433_s5, %s2610_s11  ;;  %p2614_p6 = scmp.lt.u32.totalorder %s2610_s11, %s3433_s5 }
 0x23d   :  { %p2616_p7 = pnand %p2614_p6, %p2611_p5 }
 0x23f   :  { %2619 = shalt.err (!%p2616_p7)
}
 0x240   :  { %1968 = dma.vmem_to_hbm [thread:$0]  %s1966_s4, 896, %s3433_s5, [#allocation3]  }
 0x241   :  { %2620 = dma.done.wait [#allocation3], 896  }
 0x242   :  { %2621 = vsyncadd [#allocation3], 4294966400 }
 0x243   :  { %1972 = vsyncpa [#allocation3], 1 }

</bundles_post_ra>
